<compile_context>
chip_gen: v7x
topology: tpu7x:2x2x1
jax: 0.10.0
libtpu: 0.0.40
codegen_flags: <defaults>
</compile_context>

<pallas_src>
import jax
import jax.numpy as jnp
from jax import lax
from jax.experimental import pallas as pl
from jax.experimental.pallas import tpu as pltpu


# -----------------------------------------------------------------------------
# Fused attention kernel: one grid step == one batch element.
# -----------------------------------------------------------------------------
def _attention_kernel(x_ref, w_ref, b_ref, ctx_ref, wts_ref):
    # x_ref : (1, T, H) VMEM block for this batch element
    # w_ref : (1, H)    VMEM (whole array, resident across grid steps)
    # b_ref : (1, 1)    SMEM scalar bias
    # ctx_ref: (1, 1, H) output block
    # wts_ref: (1, T, 1) output block
    x = x_ref[0]                       # (T, H) f32
    w = w_ref[...]                     # (1, H)
    bias = b_ref[0, 0]                 # scalar

    # scores = relu(x @ W^T + b)  -> computed as a lane reduction (VPU + XLU),
    # avoiding a degenerate N=1 MXU matmul with a fully-masked output column.
    scores = jnp.sum(x * w, axis=-1, keepdims=True) + bias       # (T, 1)
    scores = jnp.maximum(scores, 0.0)

    # Stable softmax over the sequence (sublane) axis.
    m = jnp.max(scores, axis=0, keepdims=True)                   # (1, 1)
    e = jnp.exp(scores - m)                                      # (T, 1)
    denom = jnp.sum(e, axis=0, keepdims=True)                    # (1, 1)
    wts = e / denom                                              # (T, 1)

    # context = weights^T @ x : single MXU matmul, contraction over T,
    # output lane dim = H (f32 accumulation).
    ctx = lax.dot_general(
        wts, x,
        dimension_numbers=(((0,), (0,)), ((), ())),
        preferred_element_type=jnp.float32)                      # (1, H)

    ctx_ref[...] = ctx[None]                                     # (1, 1, H)
    wts_ref[...] = wts[None]                                     # (1, T, 1)


def attention_forward(x, w, b):
    """x: (B, T, H); w: (1, H) (= nn.Linear(H,1).weight); b: (1,) bias.

    Returns (context (B, H), attn_weights (B, T, 1)) matching the PyTorch module.
    """
    B, T, H = x.shape
    ctx3, wts = pl.pallas_call(
        _attention_kernel,
        out_shape=(jax.ShapeDtypeStruct((B, 1, H), jnp.float32),
                   jax.ShapeDtypeStruct((B, T, 1), jnp.float32)),
        grid=(B,),
        in_specs=[
            pl.BlockSpec((1, T, H), lambda i: (i, 0, 0)),                 # x, per-batch block
            pl.BlockSpec(memory_space=pltpu.MemorySpace.VMEM),            # weight, whole array
            pl.BlockSpec(memory_space=pltpu.MemorySpace.SMEM),            # scalar bias
        ],
        out_specs=(
            pl.BlockSpec((1, 1, H), lambda i: (i, 0, 0)),
            pl.BlockSpec((1, T, 1), lambda i: (i, 0, 0)),
        ),
        compiler_params=pltpu.CompilerParams(
            dimension_semantics=("parallel",)),                           # megacore on v7x
    )(x.astype(jnp.float32),
      w.astype(jnp.float32),
      b.reshape(1, 1).astype(jnp.float32))
    return ctx3.reshape(B, H), wts


# -----------------------------------------------------------------------------
if __name__ == "__main__":
    B, T, H = 2, 8, 32  # batch=2, seq=8, hidden=32

    key = jax.random.PRNGKey(0)
    kx, kw, kb = jax.random.split(key, 3)

    x = jax.random.normal(kx, (B, T, H), jnp.float32)
    scale = 1.0 / float(jnp.sqrt(jnp.float32(H)))
    w = jax.random.uniform(kw, (1, H), jnp.float32, -scale, scale)  # Linear(H, 1).weight
    b = jax.random.uniform(kb, (1,), jnp.float32, -scale, scale)    # Linear(H, 1).bias

    context, attn_weights = jax.jit(attention_forward)(x, w, b)
    context, attn_weights = jax.block_until_ready((context, attn_weights))

    # Pure-JAX reference (mirrors the PyTorch forward exactly).
    ref_scores = jnp.maximum(jnp.einsum("bth,oh->bto", x, w) + b, 0.0)   # (B, T, 1)
    ref_weights = jax.nn.softmax(ref_scores, axis=1)
    ref_context = jnp.sum(ref_weights * x, axis=1)

    assert context.shape == (B, H)
    assert attn_weights.shape == (B, T, 1)
    assert bool(jnp.all(jnp.isfinite(context)))
    assert bool(jnp.allclose(context, ref_context, atol=1e-5, rtol=1e-5))
    assert bool(jnp.allclose(attn_weights, ref_weights, atol=1e-5, rtol=1e-5))

    print("KERNEL_OK")
</pallas_src>

<mosaic_0001>
module attributes {stable_mosaic.version = 11 : i64} {
  func.func @_attention_kernel(%arg0: i32, %arg1: memref<1x8x32xf32, #tpu.memory_space<vmem>>, %arg2: memref<1x32xf32, #tpu.memory_space<vmem>>, %arg3: memref<1x1xf32, #tpu.memory_space<smem>>, %arg4: memref<1x1x32xf32, #tpu.memory_space<vmem>>, %arg5: memref<1x8x1xf32, #tpu.memory_space<vmem>>) attributes {dimension_semantics = [#tpu.dimension_semantics<parallel>], iteration_bounds = array<i64: 2>, scalar_prefetch = 0 : i64, scratch_operands = 0 : i64, tpu.core_type = #tpu.core_type<tc>, window_params = [{transform_indices = @transform_0, window_bounds = array<i64: 1, 8, 32>}, {pipeline_mode = #tpu.pipeline_mode<synchronous>, transform_indices = @transform_1, window_bounds = array<i64: 1, 32>}, {transform_indices = @transform_2, window_bounds = array<i64: 1, 1>}, {transform_indices = @transform_3, window_bounds = array<i64: 1, 1, 32>}, {transform_indices = @transform_4, window_bounds = array<i64: 1, 8, 1>}]} {
    %c0 = arith.constant 0 : index
    %c0_0 = arith.constant 0 : index
    %c0_1 = arith.constant 0 : index
    %0 = vector.load %arg1[%c0, %c0_0, %c0_1] : memref<1x8x32xf32, #tpu.memory_space<vmem>>, vector<1x8x32xf32>
    %1 = vector.shape_cast %0 : vector<1x8x32xf32> to vector<8x32xf32>
    %c0_2 = arith.constant 0 : index
    %c0_3 = arith.constant 0 : index
    %2 = vector.load %arg2[%c0_2, %c0_3] : memref<1x32xf32, #tpu.memory_space<vmem>>, vector<1x32xf32>
    %c0_4 = arith.constant 0 : index
    %c0_5 = arith.constant 0 : index
    %3 = memref.load %arg3[%c0_4, %c0_5] : memref<1x1xf32, #tpu.memory_space<smem>>
    %4 = vector.broadcast %2 : vector<1x32xf32> to vector<8x32xf32>
    %5 = arith.mulf %1, %4 : vector<8x32xf32>
    %cst = arith.constant dense<0.000000e+00> : vector<8xf32>
    %6 = vector.multi_reduction <add>, %5, %cst [1] : vector<8x32xf32> to vector<8xf32>
    %7 = vector.shape_cast %6 : vector<8xf32> to vector<8x1xf32>
    %8 = vector.broadcast %3 : f32 to vector<8x1xf32>
    %9 = arith.addf %7, %8 : vector<8x1xf32>
    %cst_6 = arith.constant 0.000000e+00 : f32
    %10 = vector.broadcast %cst_6 : f32 to vector<8x1xf32>
    %11 = arith.maximumf %9, %10 : vector<8x1xf32>
    %cst_7 = arith.constant dense<0xFF800000> : vector<1xf32>
    %12 = vector.multi_reduction <maximumf>, %11, %cst_7 [0] : vector<8x1xf32> to vector<1xf32>
    %13 = vector.shape_cast %12 : vector<1xf32> to vector<1x1xf32>
    %14 = vector.broadcast %13 : vector<1x1xf32> to vector<8x1xf32>
    %15 = arith.subf %11, %14 : vector<8x1xf32>
    %16 = math.exp %15 : vector<8x1xf32>
    %cst_8 = arith.constant dense<0.000000e+00> : vector<1xf32>
    %17 = vector.multi_reduction <add>, %16, %cst_8 [0] : vector<8x1xf32> to vector<1xf32>
    %18 = vector.shape_cast %17 : vector<1xf32> to vector<1x1xf32>
    %19 = vector.broadcast %18 : vector<1x1xf32> to vector<8x1xf32>
    %20 = arith.divf %16, %19 : vector<8x1xf32>
    %cst_9 = arith.constant dense<0.000000e+00> : vector<1x32xf32>
    %21 = tpu.matmul %20, %1, %cst_9 {dimension_numbers = #tpu.dot_dimension_numbers<[0], [0], [1], [1], [0, 1, 1, 1], [], []>} : vector<8x1xf32>, vector<8x32xf32>, vector<1x32xf32> -> vector<1x32xf32>
    %22 = vector.shape_cast %21 : vector<1x32xf32> to vector<1x1x32xf32>
    %c0_10 = arith.constant 0 : index
    %c0_11 = arith.constant 0 : index
    %c0_12 = arith.constant 0 : index
    %23 = vector.load %arg4[%c0_10, %c0_11, %c0_12] : memref<1x1x32xf32, #tpu.memory_space<vmem>>, vector<1x1x32xf32>
    tpu.vector_store %arg4[%c0_10, %c0_11, %c0_12], %22 {strides = array<i32>} : memref<1x1x32xf32, #tpu.memory_space<vmem>>, vector<1x1x32xf32>,
    %24 = vector.shape_cast %20 : vector<8x1xf32> to vector<1x8x1xf32>
    %c0_13 = arith.constant 0 : index
    %c0_14 = arith.constant 0 : index
    %c0_15 = arith.constant 0 : index
    %25 = vector.load %arg5[%c0_13, %c0_14, %c0_15] : memref<1x8x1xf32, #tpu.memory_space<vmem>>, vector<1x8x1xf32>
    tpu.vector_store %arg5[%c0_13, %c0_14, %c0_15], %24 {strides = array<i32>} : memref<1x8x1xf32, #tpu.memory_space<vmem>>, vector<1x8x1xf32>,
    return
  }
  func.func @transform_0(%arg0: i32) -> (i32, i32, i32) {
    %c0_i32 = arith.constant 0 : i32
    %c0_i32_0 = arith.constant 0 : i32
    %c0_i32_1 = arith.constant 0 : i32
    return %arg0, %c0_i32, %c0_i32_0 : i32, i32, i32
  }
  func.func @transform_1(%arg0: i32) -> (i32, i32) {
    %c0_i32 = arith.constant 0 : i32
    %c0_i32_0 = arith.constant 0 : i32
    %c0_i32_1 = arith.constant 0 : i32
    return %c0_i32, %c0_i32_0 : i32, i32
  }
  func.func @transform_2(%arg0: i32) -> (i32, i32) {
    %c0_i32 = arith.constant 0 : i32
    %c0_i32_0 = arith.constant 0 : i32
    %c0_i32_1 = arith.constant 0 : i32
    return %c0_i32, %c0_i32_0 : i32, i32
  }
  func.func @transform_3(%arg0: i32) -> (i32, i32, i32) {
    %c0_i32 = arith.constant 0 : i32
    %c0_i32_0 = arith.constant 0 : i32
    %c0_i32_1 = arith.constant 0 : i32
    return %arg0, %c0_i32, %c0_i32_0 : i32, i32, i32
  }
  func.func @transform_4(%arg0: i32) -> (i32, i32, i32) {
    %c0_i32 = arith.constant 0 : i32
    %c0_i32_0 = arith.constant 0 : i32
    %c0_i32_1 = arith.constant 0 : i32
    return %arg0, %c0_i32, %c0_i32_0 : i32, i32, i32
  }
}

</mosaic_0001>

<bundles_post_ra>
// kernel: attention_forward.1
= control target key start
LH: loop header
LB: loop body
LE: loop exit
PB: predicated region body
PF: predicated region fallthrough
CT: control target
= control target key end

     0   :  { %s850_s0 = inlined_call_operand.hbm [shape: f32[2,8,32], index: 0, kind: input, shape index: {}]   ;;  %s851_s1 = inlined_call_operand.vmem [shape: f32[1,32], index: 1, kind: input, shape index: {}]   ;;  %s852_s2 = inlined_call_operand.<no memory space> [shape: f32[1,1], index: 2, kind: input, shape index: {}]   ;;  %s853_s3 = inlined_call_operand.hbm [shape: f32[2,1,32], index: 3, kind: output, shape index: {0}]   ;;  %s854_s4 = inlined_call_operand.vmem [shape: f32[2,8,1], index: 4, kind: output, shape index: {1}]  }
   0x1   :  { %10 = sst [smem:[#allocation2]] %s852_s2 }
   0x2   :  { %11 = vsyncpa [#allocation4], 0 }
   0x3   :  { %13 = vsyncpa [#allocation4 + $0x1], 0 }
   0x4   :  { %14 = vsyncpa [#allocation5], 0 }
   0x5   :  { %16 = vsyncpa [#allocation5 + $0x1], 0  ;;  %s680_s17 = smov 0   ;;  %s682_s18 = smov 0  }
   0x6   :  { %s684_s19 = smov 0   ;;  %s686_s20 = smov 0  }
   0x7 LB: > { %s701_s2 = sadd.s32 4294967295, %s646_s20   ;;  %s478_s21 = sadd.s32 4294967294, %s646_s20   ;;  %s646_s20 = sphi %s686_s20, %s869_s20   ;;  %s642_s19 = sphi %s684_s19, %s868_s19   ;;  %s638_s18 = sphi %s682_s18, %s867_s18   ;;  %s634_s17 = sphi %s680_s17, %s866_s17  }
   0x8   : > { %s705_s22 = sadd.s32 1, %s646_s20   ;;  %s29_s23 = sadd.s32 1, %s642_s19 }
   0x9   : > { %s26_s24 = ssub.s32 %s646_s20, %s705_s22  ;;  %p36_p0 = scmp.ne.s32.totalorder %s642_s19, %s638_s18 }
   0xa   : > { %p27_p1 = scmp.eq.s32.totalorder %s26_s24, 0  ;;  %p37_p2 = scmp.eq.s32.totalorder %s646_s20, 0 }
   0xb   : > { %p42_p3 = scmp.ne.s32.totalorder %s638_s18, %s634_s17  ;;  %p43_p4 = scmp.eq.s32.totalorder %s701_s2, 0 }
   0xc   : > { %s717_s25 = scalar_select %p27_p1, %s642_s19, %s29_s23  }
   0xd   : > { %p719_p5 = por %p37_p2, %p36_p0  ;;  %p723_p6 = por %p43_p4, %p42_p3 }
   0xe   : > { %p108_p7 = scmp.eq.s32.totalorder %s701_s2, 1  ;;  %p114_p8 = scmp.eq.s32.totalorder %s478_s21, 1 }
   0xf   : > { %p510_p10 = scmp.lt.s32.totalorder %s646_s20, 2  ;;  %s166_s30 = sand.u32 1, %s642_s19  }
  0x10   : > { %p730_p11 = por %p108_p7, %p36_p0  ;;  %p734_p12 = por %p114_p8, %p42_p3 }
  0x11   : > { %s482_s5 = sshll.u32 %s646_s20, 7  ;;  %s481_s6 = sshll.u32 %s166_s30, 3 }
  0x12   : > { %s858_s28 = scalar_select %p730_p11, 1, 0 }
  0x13   : > { %s859_s29 = scalar_select %p734_p12, 1, 0 }
  0x14   : > { %s743_s9 = scalar_lea.hbm %s850_s0, %s482_s5  ;;  %s170_s10 = scalar_lea.vmem [#allocation3], %s481_s6 }
  0x15   : > { %s177_s11 = sshll.u32 %s170_s10, 4  ;;  %p747_p13 = pnand %p510_p10, %p719_p5  ;;  %s751_s11 = int_to_ptr.vmem [resolvable:$true] %s177_s11 }
  0x16   : > { %s167_s13 = scalar_lea.sflag [#allocation4], %s166_s30  ;;  %s550_s14 = scalar_lea.hbm %s743_s9, 128 }
  0x17   : > { %p551_p2 = scmp.ne.s32.totalorder %s743_s9, %s550_s14  ;;  %p552_p3 = pneg %p747_p13 }
  0x18   : > { %s555_s21 = scalar_lea.hbm %s850_s0, 256  ;;  %p556_p5 = scmp.lt.u32.totalorder %s743_s9, %s850_s0 }
  0x19   : > { %p553_p4 = pnand %p552_p3, %p551_p2  ;;  %p557_p8 = scmp.lt.u32.totalorder %s555_s21, %s550_s14 }
  0x1a   : > { %p559_p9 = scmp.lt.u32.totalorder %s550_s14, %s743_s9 }
  0x1b   : > { %p554_p7 = pneg %p553_p4  ;;  %p558_p10 = por %p557_p8, %p556_p5 }
  0x1d   : > { %p560_p0 = por %p559_p9, %p558_p10 }
  0x1f   : > { %p561_p1 = pnand %p560_p0, %p554_p7 }
  0x21   : > { %564 = shalt.err (!%p561_p1)
}
  0x22   : > { %s565_s26 = scalar_lea.vmem %s751_s11, 128  ;;  %s648_s30 = smov [#allocation3]  }
  0x23   : > { %p566_p2 = scmp.ne.s32.totalorder %s751_s11, %s565_s26  ;;  %s570_s5 = sshll.u32 %s648_s30, 4  ;;  %s571_s5 = int_to_ptr.vmem [resolvable:$false] %s570_s5 }
  0x24   : > { %s572_s6 = scalar_lea.vmem %s571_s5, 256  ;;  %p573_p11 = scmp.lt.s32.totalorder %s751_s11, %s571_s5 }
  0x25   : > { %p568_p4 = pnand %p566_p2, %p552_p3  ;;  %p574_p5 = scmp.lt.s32.totalorder %s572_s6, %s565_s26 }
  0x27   : > { %p569_p12 = pneg %p568_p4  ;;  %p575_p8 = por %p574_p5, %p573_p11 }
  0x29   : > { %p576_p9 = pnand %p575_p8, %p569_p12 }
  0x2b   : > { %579 = shalt.err (!%p576_p9)
}
  0x2c   : > { %505 = dma.hbm_to_vmem [thread:$0]  (!%p747_p13), %s743_s9, 128, %s751_s11, %s167_s13  }
  0x2d   : > { %p861_p0 = scmp.lt.s32.totalorder %s646_s20, 3  ;;  %p862_p1 = scmp.ge.s32.totalorder %s646_s20, 1 }
  0x2f   : > { %p183_p3 = pnand %p862_p1, %p861_p0 }
  0x30   : > { %s785_s7 = sand.u32 (!%p183_p3), 1, %s638_s18  }
  0x31   : > { %186 = sbr.rel (%p183_p3) target bundleno = 615 (0x267), region = 32  ;;  %s484_s8 = sshll.u32 (!%p183_p3), %s785_s7, 3 }
  0x32   : > { %s189_s10 = scalar_lea.sflag (!%p183_p3), [#allocation4], %s785_s7  ;;  %s192_s14 = scalar_lea.vmem (!%p183_p3), [#allocation3], %s484_s8 }
  0x38   : > { %625 = dma.done.wait (%p723_p6), %s189_s10, 128  }
  0x39   : > { %627 = vsyncadd (%p723_p6), %s189_s10, 4294967168  ;;  %v224_v0 = vld [vmem:[%s192_s14] sm:$0xff]  ;;  %vm234_vm0 = vcmask 261120   ;;  %v649_v4 = vmov 0.0   ;;  %vm650_vm1 = vmmov 0   ;;  %s226_s12 = sld [smem:[#allocation2]] }
  0x3a   : > { %v486_v1 = vld [vmem:[%s851_s1] ss:$0 sm:$0xff]  ;;  %493 = vmatprep.subr.mxu0 %v649_v4  ;;  %495 = vmatprep.mubr.msk.f32.mxu0 %vm650_vm1, %v649_v4  ;;  %p220_p6 = scmp.lt.s32.totalorder %s701_s2, 1  ;;  %vm366_vm2 = vcmask 7168   ;;  %vm290_vm3 = vcmask 64512   ;;  %s488_s23 = sshll.u32 %s701_s2, 4 }
  0x3b   : > { %v233_v2 = vmul.f32 %v486_v1, %v224_v0  ;;  %494 = vmatpush3.msra.mxu0 %v224_v0  ;;  %s213_s24 = scalar_lea.vmem [#allocation6], %s785_s7  ;;  %vm364_vm4 = vcmask 253952   ;;  %s806_s6 = scalar_lea.hbm %s853_s3, %s488_s23 }
  0x3c   : > { %s221_s27 = scalar_select %p220_p6, %s701_s2, 1 }
  0x3d   : > { %v235_v3 = vsel %vm234_vm0, %v233_v2, 0.0  ;;  %s385_s26 = sshll.u32 %s213_s24, 4  ;;  %s369_s8 = scalar_lea.sflag [#allocation5], %s785_s7  ;;  %s808_s26 = int_to_ptr.vmem [resolvable:$true] %s385_s26 }
  0x3e   : > { %236 = vadd.xlane.f32.xlu0 %v235_v3  ;;  %s485_s13 = sshll.u32 %s221_s27, 3  ;;  %s580_s10 = scalar_lea.vmem %s808_s26, 16 }
  0x3f   : > { %v238_v5 = vstv %s226_s12  ;;  %s223_s21 = scalar_lea.vmem %s854_s4, %s485_s13  ;;  %p581_p11 = scmp.ne.s32.totalorder %s808_s26, %s580_s10 }
  0x40   : > { %p863_p12 = scmp.ne.s32.totalorder %s858_s28, 0  ;;  %s651_s2 = smov [#allocation6]  }
  0x41   : > { %s584_s14 = sshll.u32 %s651_s2, 4  ;;  %s585_s14 = int_to_ptr.vmem [resolvable:$false] %s584_s14 }
  0x42   : > { %p582_p13 = pnand %p581_p11, %p863_p12  ;;  %s586_s9 = scalar_lea.vmem %s585_s14, 32 }
  0x43   : > { %p587_p10 = scmp.lt.s32.totalorder %s808_s26, %s585_s14  ;;  %p588_p2 = scmp.lt.s32.totalorder %s586_s9, %s580_s10 }
  0x44   : > { %p583_p7 = pneg %p582_p13 }
  0x45   : > { %p589_p4 = por %p588_p2, %p587_p10 }
  0x47   : > { %p590_p5 = pnand %p589_p4, %p583_p7 }
  0xcb   : > { %v237_v6 = vpop.xlane.xlu0 %236 }
  0xcc   : > { %v239_v7 = vadd.f32 %v238_v5, %v237_v6 }
  0xce   : > { %v240_v8 = vmax.f32 %v239_v7, 0.0 }
  0xd0   : > { %v241_v9 = vrot.slane %v240_v8, 4 }
  0xd2   : > { %v242_v10 = vmax.f32 %v240_v8, %v241_v9 }
  0xd4   : > { %v243_v11 = vrot.slane %v242_v10, 2 }
  0xd6   : > { %v244_v12 = vmax.f32 %v242_v10, %v243_v11 }
  0xd8   : > { %v245_v13 = vrot.slane %v244_v12, 1 }
  0xda   : > { %v246_v14 = vmax.f32 %v244_v12, %v245_v13 }
  0xdc   : > { %v247_v15 = vsub.f32 %v240_v8, %v246_v14 }
  0xde   : > { %v248_v16 = vmul.f32 1.442695, %v247_v15 }
  0xe0   : > { %546 = vpow2.f32 %v248_v16 }
  0xea   : > { %v547_v17 = vpop.eup %546 }
  0xeb   : > { %v250_v18 = vrot.slane %v547_v17, 4 }
  0xed   : > { %v251_v19 = vadd.f32 %v547_v17, %v250_v18 }
  0xef   : > { %v252_v20 = vrot.slane %v251_v19, 2 }
  0xf1   : > { %v253_v21 = vadd.f32 %v252_v20, %v251_v19 }
  0xf3   : > { %v254_v22 = vrot.slane %v253_v21, 1 }
  0xf5   : > { %v255_v23 = vadd.f32 %v254_v22, %v253_v21 }
  0xf7   : > { %548 = vrcp.f32 %v255_v23 }
 0x101   : > { %v549_v24 = vpop.eup %548 }
 0x102   : > { %v257_v25 = vmul.f32 %v549_v24, %v547_v17 }
 0x104   : > { %258 = vxpose.xlu0.b32.start.end [1/1] (short) (narrow) %v257_v25, 8  ;;  %367 = vst.msk [vmem:[%s223_s21] sm:$0xff] %vm366_vm2, %v257_v25 }
 0x184   : > { %v274_v26 = vpop.trf.xlu0 }
 0x185   : > { %496 = vmatmul.mubr.msk.f32.vlgmr.msra.gmra.mrb[0].mxu0 %vm290_vm3, %v274_v26 }
 0x258   : > { %v360_v27 = vpop.f32.mrb[0].mxu0 }
 0x259   : > { %365 = vst.msk [vmem:[%s213_s24] sm:$0x1] %vm364_vm4, %v360_v27  ;;  %v497_v28 = vpop.f32.mrb[1].mxu0 }
 0x25a   : > { %593 = shalt.err (!%p590_p5)
}
 0x25b   : > { %s594_s7 = scalar_lea.hbm %s806_s6, 16  ;;  %s598_s27 = scalar_lea.hbm %s853_s3, 32 }
 0x25c   : > { %p595_p8 = scmp.ne.s32.totalorder %s806_s6, %s594_s7  ;;  %p599_p1 = scmp.lt.u32.totalorder %s806_s6, %s853_s3 }
 0x25d   : > { %p600_p3 = scmp.lt.u32.totalorder %s598_s27, %s594_s7  ;;  %p602_p11 = scmp.lt.u32.totalorder %s594_s7, %s806_s6 }
 0x25e   : > { %p596_p9 = pnand %p595_p8, %p863_p12 }
 0x25f   : > { %p601_p6 = por %p600_p3, %p599_p1 }
 0x260   : > { %p597_p0 = pneg %p596_p9 }
 0x261   : > { %p603_p13 = por %p602_p11, %p601_p6 }
 0x263   : > { %p604_p7 = pnand %p603_p13, %p597_p0 }
 0x265   : > { %607 = shalt.err (!%p604_p7)
}
 0x266   : > { %500 = dma.vmem_to_hbm [thread:$0]  (%p863_p12), %s808_s26, 16, %s806_s6, %s369_s8  }
 0x267 PF: > { %s400_s16 = sand.u32 1, %s634_s17   ;;  %p864_p10 = scmp.ne.s32.totalorder %s859_s29, 0 }
 0x268   : > { %p865_p2 = scmp.ge.s32.totalorder %s646_s20, 2  ;;  %s401_s21 = scalar_lea.sflag [#allocation5], %s400_s16 }
 0x26a   : > { %p507_p4 = pnand %p865_p2, %p864_p10 }
 0x26c   : > { %629 = dma.done.wait (!%p507_p4), %s401_s21, 16  }
 0x26d   : > { %631 = vsyncadd (!%p507_p4), %s401_s21, 4294967280  ;;  %p19_p5 = scmp.ge.s32.totalorder %s705_s22, 4   ;;  %s866_s17 = smov %s638_s18 }
 0x26e   : > { %s867_s18 = smov %s642_s19  ;;  %s868_s19 = smov %s717_s25 }
 0x26f   : > { %s869_s20 = smov %s705_s22  ;;  %21 = sbr.rel (!%p19_p5) target bundleno = 7 (0x7), region = 89 }
 0x276   :  { %412 = vsyncpa [#allocation4], 1 }
 0x277   :  { %414 = vsyncpa [#allocation4 + $0x1], 1 }
 0x278   :  { %415 = vsyncpa [#allocation5], 1 }
 0x279   :  { %417 = vsyncpa [#allocation5 + $0x1], 1 }

</bundles_post_ra>
